<compile_context>
chip_gen: v7x
topology: tpu7x:2x2x1
jax: 0.10.0
libtpu: 0.0.40
codegen_flags: <defaults>
</compile_context>

<pallas_src>
import jax
import jax.numpy as jnp
from jax.experimental import pallas as pl
from jax.experimental.pallas import tpu as pltpu

# ---------------- config ----------------
HIDDEN = 32                     # cfg.hidden_size
PROJ = 16                       # config.projection_dim
PATCH = 4                       # ViT patch size of the stand-in backbone
IMG = 16                        # each camera crop is IMG x IMG
N_CAM = 2                       # Npatch after dropping the processor's first crop
GRID = IMG // PATCH
NUM_PATCHES = GRID * GRID       # 16 patches per crop
K_PATCH = 3 * PATCH * PATCH     # 48 = flattened conv receptive field
PAIR_ROWS = N_CAM * NUM_PATCHES # 32 tokens per (b, t) frame, order (cam, patch)

# Parameter-slab layout (rows; all offsets are multiples of 8 sublanes).
SLAB_ROWS = 128
SLAB_COLS = 32
ROW_PW = 0                      # rows  0..47 : folded patch weight  (48, 32)
ROW_PB = 48                     # row   48    : folded patch bias    (1, 32)
ROW_PWT = 56                    # rows 56..87 : projector weight^T   (32, 16)
ROW_CB = 88                     # rows 88..119: per-(cam,patch) bias (32, 16)


# ---------------- fused Pallas kernel ----------------
def fused_rgb_kernel(rows_ref, slab_ref, o_ref):
    # Static slices of the packed parameter slab (free: no extra DMA).
    pw = slab_ref[ROW_PW:ROW_PW + K_PATCH, :]                  # (48, 32)
    pb = slab_ref[ROW_PB:ROW_PB + 1, :]                        # (1, 32)
    pwt = slab_ref[ROW_PWT:ROW_PWT + HIDDEN, 0:PROJ]           # (32, 16)
    pair_bias = slab_ref[ROW_CB:ROW_CB + PAIR_ROWS, 0:PROJ]    # (32, 16)

    # ViT patch-embedding conv stem as a matmul (stride == kernel); the
    # processor normalization (x-0.5)/0.5 is already folded into pw/pb.
    feats = jnp.dot(rows_ref[...], pw,
                    preferred_element_type=jnp.float32) + pb   # (ROWS, 32)

    # TODO(synk): the pretrained HF AutoModel's transformer encoder layers and
    # the hidden_states[select_layer] selection (CLS handling is a no-op under
    # ignore_cls=True) have no in-script equivalent; the patch embeddings stand
    # in for the selected hidden state.  When a real backbone is fused in, add
    # a row-block grid (dimension_semantics=("parallel",)) for v7x's 2 TCs and
    # size weight tiles for v7x's 64 MiB VMEM (vmem_limit_bytes set explicitly).

    # Projector Linear; the camera embeddings + projector bias are the
    # per-(camera, patch) pair_bias rows (token order within a frame is
    # (cam, patch), so the bias pattern repeats every PAIR_ROWS output rows).
    out = jnp.dot(feats, pwt, preferred_element_type=jnp.float32)  # (ROWS, 16)

    n_frames = o_ref.shape[0] // PAIR_ROWS                     # static int
    for b in range(n_frames):
        sl = slice(b * PAIR_ROWS, (b + 1) * PAIR_ROWS)
        o_ref[sl, :] = out[sl, :] + pair_bias


# ---------------- forward (wrapper) ----------------
def rgb_encoder_forward(params, x):
    # x: (B, T, IMG, 2*IMG, 3) float32 in [0, 1]
    original_shape = x.shape
    xb = x.reshape(-1, *original_shape[-3:])            # (B*T, IMG, 2*IMG, 3)
    bt = xb.shape[0]
    n_rows = bt * PAIR_ROWS

    # Processor emulation: center_crop is identity at these shapes; the first
    # full-view crop is dropped by `prepped_x[:, 1:]`, so only the two camera
    # halves are used.  Patch rows are extracted with a single
    # reshape->transpose->reshape (no stack) in (kh, kw, C) order; with
    # allow_input_fusion XLA may fold this transpose into the Pallas operand
    # DMA so the (n_rows, 48) intermediate never hits HBM.
    p = xb.reshape(bt, GRID, PATCH, N_CAM, GRID, PATCH, 3)
    p = jnp.transpose(p, (0, 3, 1, 4, 2, 5, 6))   # (b, cam, gh, gw, kh, kw, c)
    rows = p.reshape(n_rows, K_PATCH)             # (64, 48)

    vmem = pl.BlockSpec(memory_space=pltpu.MemorySpace.VMEM)
    out = pl.pallas_call(
        fused_rgb_kernel,
        out_shape=jax.ShapeDtypeStruct((n_rows, PROJ), jnp.float32),
        in_specs=[vmem, vmem],
        out_specs=vmem,
        compiler_params=pltpu.CompilerParams(
            allow_input_fusion=[True, False]),
    )(rows, params["param_slab"])

    # masking_rate == 0.0 (eval path) -> no token masking applied.
    out = out.reshape(bt, PAIR_ROWS, PROJ)              # flatten(1, 2) tokens
    if len(original_shape) == 5:                        # restore (B, T, ...)
        out = out.reshape(original_shape[0], original_shape[1], *out.shape[1:])
    return out


# ---------------- pure-JAX reference (unfused, PyTorch-faithful path) --------
def rgb_encoder_reference(params, x):
    hp = jax.lax.Precision.HIGHEST
    original_shape = x.shape
    xb = x.reshape(-1, *original_shape[-3:])
    xn = (xb - 0.5) / 0.5                               # processor normalization
    xn = jnp.transpose(xn, (0, 3, 1, 2))                # NHWC -> NCHW
    crops = jnp.stack([xn[:, :, :, :IMG], xn[:, :, :, IMG:]], axis=1)
    bt = crops.shape[0]
    imgs = crops.reshape(bt * N_CAM, 3, IMG, IMG)
    p = imgs.reshape(-1, 3, GRID, PATCH, GRID, PATCH)
    p = jnp.transpose(p, (0, 2, 4, 1, 3, 5))            # (N, gh, gw, C, kh, kw)
    rows = p.reshape(-1, K_PATCH)
    w = params["conv_w"].reshape(HIDDEN, K_PATCH).T     # Conv2d (C,kh,kw) flatten
    feats = jnp.dot(rows, w, precision=hp)
    feats = feats.reshape(bt, N_CAM, NUM_PATCHES, HIDDEN)
    feats = feats + params["cam_emb"][None, :, None, :]
    out = jnp.dot(feats.reshape(-1, HIDDEN), params["proj_w"].T,
                  precision=hp) + params["proj_b"][None, :]
    out = out.reshape(bt, PAIR_ROWS, PROJ)
    if len(original_shape) == 5:
        out = out.reshape(original_shape[0], original_shape[1], *out.shape[1:])
    return out


# ---------------- params ----------------
def init_params(key):
    k1, k2, k3, k4 = jax.random.split(key, 4)
    # Raw parameters in PyTorch layouts (used by the reference).
    conv_w = jax.random.normal(k1, (HIDDEN, 3, PATCH, PATCH), jnp.float32) * 0.02
    proj_w = jax.random.normal(k2, (PROJ, HIDDEN), jnp.float32) * 0.02
    proj_b = jax.random.normal(k3, (PROJ,), jnp.float32) * 0.02
    cam_emb = jax.random.normal(k4, (N_CAM, HIDDEN), jnp.float32) * 0.02

    # ---- init-time folds consumed by the fused kernel ----
    # (a) permute the static conv weight to (kh, kw, C) flatten order so the
    #     activations can stay NHWC.
    w_hwc = jnp.transpose(conv_w, (0, 2, 3, 1)).reshape(HIDDEN, K_PATCH).T  # (48,32)
    # (b) fold normalization (x-0.5)/0.5 == 2x-1:  (2x-1)@W = x@(2W) - colsum(W)
    patch_w_fold = 2.0 * w_hwc                                               # (48,32)
    patch_b_fold = -jnp.sum(w_hwc, axis=0)                                   # (32,)
    # (c) fold camera embeddings through the projector into a per-camera bias,
    #     replicated per patch -> per-(cam, patch) bias for one frame's tokens.
    proj_w_t = proj_w.T                                                      # (32,16)
    cam_bias = cam_emb @ proj_w_t + proj_b[None, :]                          # (2,16)
    pair_bias = jnp.repeat(cam_bias, NUM_PATCHES, axis=0)                    # (32,16)

    # (d) pack everything the kernel needs into ONE zero-padded slab.
    slab = jnp.zeros((SLAB_ROWS, SLAB_COLS), jnp.float32)
    slab = slab.at[ROW_PW:ROW_PW + K_PATCH, :HIDDEN].set(patch_w_fold)
    slab = slab.at[ROW_PB, :HIDDEN].set(patch_b_fold)
    slab = slab.at[ROW_PWT:ROW_PWT + HIDDEN, :PROJ].set(proj_w_t)
    slab = slab.at[ROW_CB:ROW_CB + PAIR_ROWS, :PROJ].set(pair_bias)

    return {
        "conv_w": conv_w, "proj_w": proj_w, "proj_b": proj_b, "cam_emb": cam_emb,
        "param_slab": slab,
    }


if __name__ == "__main__":
    key = jax.random.PRNGKey(0)
    pkey, xkey = jax.random.split(key)
    params = init_params(pkey)
    # (B=2, T=1, H=16, W=32, C=3) dual-camera wide image, values in [0, 1]
    x = jax.random.uniform(xkey, (2, 1, IMG, 2 * IMG, 3), jnp.float32)

    out = jax.jit(rgb_encoder_forward)(params, x)
    out = jax.block_until_ready(out)

    assert out.shape == (2, 1, PAIR_ROWS, PROJ), out.shape
    assert out.dtype == jnp.float32

    ref = rgb_encoder_reference(params, x)
    max_err = float(jnp.max(jnp.abs(out - ref)))
    assert max_err < 1e-5, f"max abs error {max_err}"

    print("KERNEL_OK")
</pallas_src>

<mosaic_0001>
module attributes {stable_mosaic.version = 11 : i64} {
  func.func @fused_rgb_kernel(%arg0: memref<64x48xf32, #tpu.memory_space<vmem>>, %arg1: memref<128x32xf32, #tpu.memory_space<vmem>>, %arg2: memref<64x16xf32, #tpu.memory_space<vmem>>) attributes {dimension_semantics = [], scalar_prefetch = 0 : i64, scratch_operands = 0 : i64, tpu.core_type = #tpu.core_type<tc>} {
    %c0 = arith.constant 0 : index
    %c0_0 = arith.constant 0 : index
    %0 = vector.load %arg1[%c0, %c0_0] : memref<128x32xf32, #tpu.memory_space<vmem>>, vector<48x32xf32>
    %c48 = arith.constant 48 : index
    %c0_1 = arith.constant 0 : index
    %1 = vector.load %arg1[%c48, %c0_1] : memref<128x32xf32, #tpu.memory_space<vmem>>, vector<1x32xf32>
    %c56 = arith.constant 56 : index
    %c0_2 = arith.constant 0 : index
    %2 = vector.load %arg1[%c56, %c0_2] : memref<128x32xf32, #tpu.memory_space<vmem>>, vector<32x16xf32>
    %c88 = arith.constant 88 : index
    %c0_3 = arith.constant 0 : index
    %3 = vector.load %arg1[%c88, %c0_3] : memref<128x32xf32, #tpu.memory_space<vmem>>, vector<32x16xf32>
    %c0_4 = arith.constant 0 : index
    %c0_5 = arith.constant 0 : index
    %4 = vector.load %arg0[%c0_4, %c0_5] : memref<64x48xf32, #tpu.memory_space<vmem>>, vector<64x48xf32>
    %cst = arith.constant dense<0.000000e+00> : vector<64x32xf32>
    %5 = tpu.matmul %4, %0, %cst {dimension_numbers = #tpu.dot_dimension_numbers<[1], [0], [0], [1], [0, 0, 1, 1], [], []>} : vector<64x48xf32>, vector<48x32xf32>, vector<64x32xf32> -> vector<64x32xf32>
    %6 = vector.broadcast %1 : vector<1x32xf32> to vector<64x32xf32>
    %7 = arith.addf %5, %6 : vector<64x32xf32>
    %cst_6 = arith.constant dense<0.000000e+00> : vector<64x16xf32>
    %8 = tpu.matmul %7, %2, %cst_6 {dimension_numbers = #tpu.dot_dimension_numbers<[1], [0], [0], [1], [0, 0, 1, 1], [], []>} : vector<64x32xf32>, vector<32x16xf32>, vector<64x16xf32> -> vector<64x16xf32>
    %9 = vector.extract_strided_slice %8 {offsets = [0, 0], sizes = [32, 16], strides = [1, 1]} : vector<64x16xf32> to vector<32x16xf32>
    %10 = arith.addf %9, %3 : vector<32x16xf32>
    %c0_7 = arith.constant 0 : index
    %c0_8 = arith.constant 0 : index
    %11 = vector.load %arg2[%c0_7, %c0_8] : memref<64x16xf32, #tpu.memory_space<vmem>>, vector<32x16xf32>
    tpu.vector_store %arg2[%c0_7, %c0_8], %10 {strides = array<i32>} : memref<64x16xf32, #tpu.memory_space<vmem>>, vector<32x16xf32>,
    %12 = vector.extract_strided_slice %8 {offsets = [32, 0], sizes = [32, 16], strides = [1, 1]} : vector<64x16xf32> to vector<32x16xf32>
    %13 = arith.addf %12, %3 : vector<32x16xf32>
    %c32 = arith.constant 32 : index
    %c0_9 = arith.constant 0 : index
    %14 = vector.load %arg2[%c32, %c0_9] : memref<64x16xf32, #tpu.memory_space<vmem>>, vector<32x16xf32>
    tpu.vector_store %arg2[%c32, %c0_9], %13 {strides = array<i32>} : memref<64x16xf32, #tpu.memory_space<vmem>>, vector<32x16xf32>,
    return
  }
}

</mosaic_0001>

<bundles_post_ra>
// kernel: rgb_encoder_forward.1
= control target key start
LH: loop header
LB: loop body
LE: loop exit
PB: predicated region body
PF: predicated region fallthrough
CT: control target
= control target key end

     0   :  { %vm38_vm0 = vcmask 392192   ;;  %vm168_vm1 = vcmask 261120   ;;  %vm302_vm2 = vcmask 130048   ;;  %s558_s1 = inlined_call_operand.vmem [shape: f32[128,32], index: 1, kind: input, shape index: {}]   ;;  %s559_s0 = inlined_call_operand.vmem [shape: f32[64,48], index: 0, kind: input, shape index: {}]   ;;  %s560_s2 = inlined_call_operand.vmem [shape: f32[64,16], index: 2, kind: output, shape index: {}]  }
   0x1   :  { %v11_v0 = vld [vmem:[%s558_s1] sm:$0xff]  ;;  %v12_v1 = vld [vmem:[%s558_s1 + $0x8] sm:$0xff]  ;;  %v13_v2 = vld [vmem:[%s558_s1 + $0x10] sm:$0xff] }
   0x2   :  { %v406_v3 = vpack.c.bf16 %v12_v1, %v11_v0  ;;  %v14_v4 = vld [vmem:[%s558_s1 + $0x18] sm:$0xff]  ;;  %v15_v6 = vld [vmem:[%s558_s1 + $0x20] sm:$0xff]  ;;  %v16_v7 = vld [vmem:[%s558_s1 + $0x28] sm:$0xff] }
   0x3   :  { %v410_v5 = vpack.c.bf16 %v14_v4, %v13_v2  ;;  %v26_v8 = vld [vmem:[%s559_s0] sm:$0xff]  ;;  %v18_v9 = vld [vmem:[%s558_s1 + $0x38] sm:$0xff]  ;;  %v414_v10 = vpack.c.bf16 %v16_v7, %v15_v6  ;;  %v27_v13 = vld [vmem:[%s559_s0 + $0x8] sm:$0xff] }
   0x4   :  { %407 = vmatprep.subr.bf16.mxu0 %v406_v3  ;;  %374 = vmatprep.mubr.msk.f32.mxu0 %vm38_vm0, %v26_v8  ;;  %v19_v11 = vld [vmem:[%s558_s1 + $0x40] sm:$0xff]  ;;  %v28_v14 = vld [vmem:[%s559_s0 + $0x10] sm:$0xff]  ;;  %v29_v15 = vld [vmem:[%s559_s0 + $0x18] sm:$0xff] }
   0x5   :  { %409 = vmatpush3.bf16.msra.mxu0 %v406_v3  ;;  %v418_v12 = vpack.c.bf16 %v19_v11, %v18_v9  ;;  %v30_v16 = vld [vmem:[%s559_s0 + $0x20] sm:$0xff]  ;;  %v31_v17 = vld [vmem:[%s559_s0 + $0x28] sm:$0xff]  ;;  %v32_v18 = vld [vmem:[%s559_s0 + $0x30] sm:$0xff] }
   0x6   :  { %411 = vmatprep.subr.bf16.mxu0 %v410_v5  ;;  %v33_v19 = vld [vmem:[%s559_s0 + $0x38] sm:$0xff]  ;;  %v20_v20 = vld [vmem:[%s558_s1 + $0x48] sm:$0xff]  ;;  %v21_v21 = vld [vmem:[%s558_s1 + $0x50] sm:$0xff] }
   0x7   :  { %419 = vmatprep.subr.bf16.mxu1 %v418_v12  ;;  %v422_v22 = vpack.c.bf16 %v21_v21, %v20_v20  ;;  %v319_v23 = vld [vmem:[%s558_s1 + $0x30] ss:$0 sm:$0xff]  ;;  %v23_v40 = vld [vmem:[%s558_s1 + $0x60] sm:$0xff]  ;;  %v22_v41 = vld [vmem:[%s558_s1 + $0x58] sm:$0xff] }
   0x8   :  { %421 = vmatpush3.bf16.msra.mxu1 %v418_v12  ;;  %v25_v46 = vld [vmem:[%s558_s1 + $0x70] sm:$0xff]  ;;  %v24_v47 = vld [vmem:[%s558_s1 + $0x68] sm:$0xff] }
   0x9   :  { %413 = vmatpush3.bf16.msra.mxu0 %v410_v5  ;;  %423 = vmatprep.subr.bf16.mxu1 %v422_v22 }
   0xa   :  { %415 = vmatprep.subr.bf16.mxu0 %v414_v10 }
   0xc   :  { %425 = vmatpush3.bf16.msra.mxu1 %v422_v22 }
   0xd   :  { %417 = vmatpush3.bf16.msra.mxu0 %v414_v10 }
  0x10   :  { %375 = vmatmul.mubr.msk.f32.vlgmr.msra.gmra.mrb[0].mxu0 %vm38_vm0, %v27_v13 }
  0x11   :  { %377 = vmatprep.mubr.msk.f32.mxu0 %vm38_vm0, %v28_v14 }
  0x14   :  { %378 = vmatmul.mubr.msk.f32.gmra.mrb[2].mxu0 %vm38_vm0, %v29_v15 }
  0x15   :  { %380 = vmatprep.mubr.msk.f32.mxu0 %vm38_vm0, %v30_v16 }
  0x18   :  { %381 = vmatmul.mubr.msk.f32.gmra.mrb[4].mxu0 %vm38_vm0, %v31_v17 }
  0x19   :  { %383 = vmatprep.mubr.msk.f32.mxu0 %vm38_vm0, %v32_v18 }
  0x1c   :  { %384 = vmatmul.mubr.msk.f32.gmra.mrb[6].mxu0 %vm38_vm0, %v33_v19 }
  0xe3   :  { %v376_v24 = vpop.f32.mrb[0].mxu0 }
  0xe4   :  { %v129_v25 = vpop.f32.mrb[1].mxu0  ;;  %v135_v27 = vadd.f32 %v376_v24, %v319_v23 }
  0xe5   :  { %v130_v26 = vadd.f32 %v319_v23, %v129_v25 }
  0xe7   :  { %v379_v28 = vpop.f32.mrb[2].mxu0  ;;  %394 = vmatprep.mubr.msk.f32.mxu1 %vm168_vm1, %v130_v26 }
  0xe8   :  { %v139_v29 = vpop.f32.mrb[3].mxu0  ;;  %395 = vmatmul.mubr.msk.f32.vlgmr.msra.gmra.mrb[0].mxu1 %vm168_vm1, %v135_v27  ;;  %v145_v31 = vadd.f32 %v379_v28, %v319_v23 }
  0xe9   :  { %v140_v30 = vadd.f32 %v319_v23, %v139_v29 }
  0xeb   :  { %v382_v32 = vpop.f32.mrb[4].mxu0  ;;  %397 = vmatprep.mubr.msk.f32.mxu1 %vm168_vm1, %v140_v30 }
  0xec   :  { %v149_v33 = vpop.f32.mrb[5].mxu0  ;;  %398 = vmatmul.mubr.msk.f32.gmra.mrb[2].mxu1 %vm168_vm1, %v145_v31  ;;  %v155_v35 = vadd.f32 %v382_v32, %v319_v23 }
  0xed   :  { %v150_v34 = vadd.f32 %v319_v23, %v149_v33 }
  0xef   :  { %v385_v36 = vpop.f32.mrb[6].mxu0  ;;  %400 = vmatprep.mubr.msk.f32.mxu1 %vm168_vm1, %v150_v34 }
  0xf0   :  { %v159_v37 = vpop.f32.mrb[7].mxu0  ;;  %401 = vmatmul.mubr.msk.f32.gmra.mrb[4].mxu1 %vm168_vm1, %v155_v35  ;;  %v165_v39 = vadd.f32 %v385_v36, %v319_v23 }
  0xf1   :  { %v160_v38 = vadd.f32 %v319_v23, %v159_v37 }
  0xf3   :  { %403 = vmatprep.mubr.msk.f32.mxu1 %vm168_vm1, %v160_v38 }
  0xf4   :  { %404 = vmatmul.mubr.msk.f32.gmra.mrb[6].mxu1 %vm168_vm1, %v165_v39 }
 0x1bb   :  { %v396_v42 = vpop.f32.mrb[0].mxu1 }
 0x1bc   :  { %v299_v43 = vadd.f32 %v396_v42, %v23_v40  ;;  %v259_v44 = vpop.f32.mrb[1].mxu1 }
 0x1bd   :  { %v298_v45 = vadd.f32 %v259_v44, %v22_v41 }
 0x1be   :  { %304 = vst.msk [vmem:[%s560_s2 + $0x8] sm:$0xff] %vm302_vm2, %v299_v43 }
 0x1bf   :  { %303 = vst.msk [vmem:[%s560_s2] sm:$0xff] %vm302_vm2, %v298_v45  ;;  %v399_v48 = vpop.f32.mrb[2].mxu1 }
 0x1c0   :  { %v301_v49 = vadd.f32 %v399_v48, %v25_v46  ;;  %v269_v50 = vpop.f32.mrb[3].mxu1 }
 0x1c1   :  { %v300_v51 = vadd.f32 %v269_v50, %v24_v47 }
 0x1c2   :  { %306 = vst.msk [vmem:[%s560_s2 + $0x18] sm:$0xff] %vm302_vm2, %v301_v49 }
 0x1c3   :  { %305 = vst.msk [vmem:[%s560_s2 + $0x10] sm:$0xff] %vm302_vm2, %v300_v51  ;;  %v402_v52 = vpop.f32.mrb[4].mxu1 }
 0x1c4   :  { %v308_v53 = vadd.f32 %v402_v52, %v23_v40  ;;  %v279_v54 = vpop.f32.mrb[5].mxu1 }
 0x1c5   :  { %v307_v55 = vadd.f32 %v279_v54, %v22_v41 }
 0x1c6   :  { %312 = vst.msk [vmem:[%s560_s2 + $0x28] sm:$0xff] %vm302_vm2, %v308_v53 }
 0x1c7   :  { %311 = vst.msk [vmem:[%s560_s2 + $0x20] sm:$0xff] %vm302_vm2, %v307_v55  ;;  %v405_v56 = vpop.f32.mrb[6].mxu1 }
 0x1c8   :  { %v310_v57 = vadd.f32 %v405_v56, %v25_v46  ;;  %v289_v58 = vpop.f32.mrb[7].mxu1 }
 0x1c9   :  { %v309_v59 = vadd.f32 %v289_v58, %v24_v47 }
 0x1ca   :  { %314 = vst.msk [vmem:[%s560_s2 + $0x38] sm:$0xff] %vm302_vm2, %v310_v57 }
 0x1cb   :  { %313 = vst.msk [vmem:[%s560_s2 + $0x30] sm:$0xff] %vm302_vm2, %v309_v59 }

</bundles_post_ra>
